<compile_context>
chip_gen: v5e
topology: v5e:2x2
jax: 0.10.0
libtpu: 0.0.40
codegen_flags: <defaults>
</compile_context>

<pallas_src>
import math
from functools import partial

import jax
import jax.numpy as jnp
from jax.experimental import pallas as pl
from jax.experimental.pallas import tpu as pltpu


_EPS = 1e-12  # matches torch.nn.functional.normalize default


def _round_up(x: int, m: int) -> int:
    return (x + m - 1) // m * m


def _arc_margin_kernel(x_ref, wt_ref, o_ref):
    """Compute one (tile_b, tile_n) tile of the cosine matrix.

    x_ref  : (tile_b, K)      f32   raw features (normalized here)
    wt_ref : (K, tile_n)      bf16  pre-normalized weight, (K, N) layout
    o_ref  : (tile_b, tile_n) f32   cosine output tile
    """
    x = x_ref[...].astype(jnp.float32)
    # x / max(||x||, eps)  ==  x * rsqrt(max(||x||^2, eps^2))
    ss = jnp.sum(x * x, axis=-1, keepdims=True)
    inv_norm = jax.lax.rsqrt(jnp.maximum(ss, jnp.float32(_EPS * _EPS)))
    xn = (x * inv_norm).astype(jnp.bfloat16)  # bf16 operand for the MXU

    # (tile_b, K) @ (K, tile_n) -> (tile_b, tile_n), f32 accumulation on MXU.
    cosine = jnp.dot(xn, wt_ref[...], preferred_element_type=jnp.float32)
    o_ref[...] = cosine.astype(o_ref.dtype)


def arc_margin_product(features: jax.Array, weight: jax.Array,
                       *, tile_b: int = 128, tile_n: int = 512) -> jax.Array:
    """cosine = normalize(features) @ normalize(weight).T via a Pallas kernel."""
    B, K = features.shape
    N, K2 = weight.shape
    assert K == K2, "in_features mismatch"

    # --- Hoisted weight normalization (parameter, reused across batches) ----
    w32 = weight.astype(jnp.float32)
    w_norm = jnp.sqrt(jnp.sum(w32 * w32, axis=1, keepdims=True))
    wt = (w32 / jnp.maximum(w_norm, jnp.float32(_EPS))).T  # (K, N)
    wt = wt.astype(jnp.bfloat16)

    # --- Tile sizes: sublane-aligned batch tile, lane-aligned class tile ----
    tb = _round_up(min(tile_b, B), 8)
    tn = _round_up(min(tile_n, N), 128)
    b_pad = _round_up(B, tb)
    n_pad = _round_up(N, tn)

    x = features.astype(jnp.float32)
    if b_pad != B:
        x = jnp.pad(x, ((0, b_pad - B), (0, 0)))
    if n_pad != N:
        wt = jnp.pad(wt, ((0, 0), (0, n_pad - N)))

    # Weight-stationary schedule: N tiles on the outer grid axis, B tiles on
    # the inner axis -> each weight tile is DMA'd once and reused across all
    # batch tiles; the (small) feature tile is re-streamed.
    grid = (n_pad // tn, b_pad // tb)

    out = pl.pallas_call(
        _arc_margin_kernel,
        out_shape=jax.ShapeDtypeStruct((b_pad, n_pad), jnp.float32),
        grid_spec=pltpu.PrefetchScalarGridSpec(
            num_scalar_prefetch=0,
            grid=grid,
            in_specs=[
                pl.BlockSpec((tb, K), lambda n, b: (b, 0)),   # features
                pl.BlockSpec((K, tn), lambda n, b: (0, n)),   # weight (K, N)
            ],
            out_specs=pl.BlockSpec((tb, tn), lambda n, b: (b, n)),
        ),
        compiler_params=pltpu.CompilerParams(
            # No reduction axis (K un-tiled) -> both axes are independent;
            # shards across both TensorCores on v7x, no-op on v5e/v6e.
            dimension_semantics=("parallel", "parallel"),
            # Safe on every generation (<= 64 MiB v7x physical VMEM) while
            # allowing larger double-buffered weight tiles than the default
            # scoped limit.
            vmem_limit_bytes=48 * 1024 * 1024,
        ),
    )(x, wt)

    if b_pad != B or n_pad != N:
        out = out[:B, :N]
    return out


def init_arc_weight(key, in_features: int, out_features: int) -> jax.Array:
    """Matches ArcMarginProduct.reset_parameters: uniform(-stdv, stdv)."""
    stdv = 1.0 / math.sqrt(in_features)
    return jax.random.uniform(
        key, (out_features, in_features), dtype=jnp.float32,
        minval=-stdv, maxval=stdv,
    )


if __name__ == "__main__":
    in_features = 128
    out_features = 512
    batch = 32

    key = jax.random.PRNGKey(0)
    k_feat, k_w = jax.random.split(key)

    features = jax.random.normal(k_feat, (batch, in_features), dtype=jnp.float32)
    weight = init_arc_weight(k_w, in_features, out_features)

    # Small tiles here so the demo exercises a real 2x2 grid.
    fwd = jax.jit(partial(arc_margin_product, tile_b=16, tile_n=256))
    cosine = fwd(features, weight)
    jax.block_until_ready(cosine)

    # Reference in plain JAX f32 (same math as torch F.normalize + F.linear).
    fn = features / jnp.maximum(
        jnp.linalg.norm(features, axis=1, keepdims=True), 1e-12)
    wn = weight / jnp.maximum(
        jnp.linalg.norm(weight, axis=1, keepdims=True), 1e-12)
    ref = fn @ wn.T

    assert cosine.shape == (batch, out_features)
    # bf16 MXU operands -> ~1e-3..1e-2 absolute error on cosines in [-1, 1].
    assert jnp.allclose(cosine, ref, atol=2e-2, rtol=2e-2), float(
        jnp.max(jnp.abs(cosine - ref)))

    print("KERNEL_OK")
</pallas_src>

<mosaic_0001>
module attributes {stable_mosaic.version = 11 : i64} {
  func.func @_arc_margin_kernel(%arg0: i32, %arg1: i32, %arg2: memref<16x128xf32, #tpu.memory_space<vmem>>, %arg3: memref<128x256xbf16, #tpu.memory_space<vmem>>, %arg4: memref<16x256xf32, #tpu.memory_space<vmem>>) attributes {dimension_semantics = [#tpu.dimension_semantics<parallel>, #tpu.dimension_semantics<parallel>], iteration_bounds = array<i64: 2, 2>, scalar_prefetch = 0 : i64, scratch_operands = 0 : i64, tpu.core_type = #tpu.core_type<tc>, window_params = [{transform_indices = @transform_0, window_bounds = array<i64: 16, 128>}, {transform_indices = @transform_1, window_bounds = array<i64: 128, 256>}, {transform_indices = @transform_2, window_bounds = array<i64: 16, 256>}]} {
    %c0 = arith.constant 0 : index
    %c0_0 = arith.constant 0 : index
    %0 = vector.load %arg2[%c0, %c0_0] : memref<16x128xf32, #tpu.memory_space<vmem>>, vector<16x128xf32>
    %1 = arith.mulf %0, %0 : vector<16x128xf32>
    %cst = arith.constant dense<0.000000e+00> : vector<16xf32>
    %2 = vector.multi_reduction <add>, %1, %cst [1] : vector<16x128xf32> to vector<16xf32>
    %3 = vector.shape_cast %2 : vector<16xf32> to vector<16x1xf32>
    %cst_1 = arith.constant 1.000000e-24 : f32
    %4 = vector.broadcast %cst_1 : f32 to vector<16x1xf32>
    %5 = arith.maximumf %3, %4 : vector<16x1xf32>
    %6 = math.rsqrt %5 : vector<16x1xf32>
    %7 = vector.broadcast %6 : vector<16x1xf32> to vector<16x128xf32>
    %8 = arith.mulf %0, %7 : vector<16x128xf32>
    %9 = arith.truncf %8 : vector<16x128xf32> to vector<16x128xbf16>
    %c0_2 = arith.constant 0 : index
    %c0_3 = arith.constant 0 : index
    %10 = vector.load %arg3[%c0_2, %c0_3] : memref<128x256xbf16, #tpu.memory_space<vmem>>, vector<128x256xbf16>
    %cst_4 = arith.constant dense<0.000000e+00> : vector<16x256xf32>
    %11 = tpu.matmul %9, %10, %cst_4 {dimension_numbers = #tpu.dot_dimension_numbers<[1], [0], [0], [1], [0, 0, 1, 1], [], []>} : vector<16x128xbf16>, vector<128x256xbf16>, vector<16x256xf32> -> vector<16x256xf32>
    %c0_5 = arith.constant 0 : index
    %c0_6 = arith.constant 0 : index
    %12 = vector.load %arg4[%c0_5, %c0_6] : memref<16x256xf32, #tpu.memory_space<vmem>>, vector<16x256xf32>
    tpu.vector_store %arg4[%c0_5, %c0_6], %11 {strides = array<i32>} : memref<16x256xf32, #tpu.memory_space<vmem>>, vector<16x256xf32>,
    return
  }
  func.func @transform_0(%arg0: i32, %arg1: i32) -> (i32, i32) {
    %c0_i32 = arith.constant 0 : i32
    %c0_i32_0 = arith.constant 0 : i32
    return %arg1, %c0_i32 : i32, i32
  }
  func.func @transform_1(%arg0: i32, %arg1: i32) -> (i32, i32) {
    %c0_i32 = arith.constant 0 : i32
    %c0_i32_0 = arith.constant 0 : i32
    return %c0_i32, %arg0 : i32, i32
  }
  func.func @transform_2(%arg0: i32, %arg1: i32) -> (i32, i32) {
    %c0_i32 = arith.constant 0 : i32
    return %arg1, %arg0 : i32, i32
  }
}

</mosaic_0001>

<bundles_post_ra>
// kernel: arc_margin_product.1
= control target key start
LH: loop header
LB: loop body
LE: loop exit
PB: predicated region body
PF: predicated region fallthrough
CT: control target
= control target key end

     0   :  { %7 = vsyncpa [#allocation4], 0  ;;  %s1093_s0 = inlined_call_operand.vmem [shape: f32[32,128], index: 0, kind: input, shape index: {}]   ;;  %s1094_s1 = inlined_call_operand.vmem [shape: bf16[128,512], index: 1, kind: input, shape index: {}]   ;;  %s1095_s2 = inlined_call_operand.hbm [shape: f32[32,512], index: 2, kind: output, shape index: {}]  }
   0x1   :  { %9 = vsyncpa [#allocation4 + $0x1], 0  ;;  %s876_s9 = smov 0   ;;  %s878_s10 = smov 0  }
   0x2   :  { %s880_s11 = smov 0   ;;  %s882_s12 = smov 0  }
   0x3   :  { %s884_s13 = smov 0   ;;  %s886_s14 = smov 0  }
   0x4   :  { %s888_s15 = smov 0   ;;  %s890_s16 = smov 0  }
   0x5   :  { %s892_s17 = smov 0   ;;  %s894_s18 = smov 0  }
   0x6 LB: > { %s551_s19 = sadd.s32 4294967295, %s856_s18   ;;  %s552_s20 = sadd.s32 4294967294, %s856_s18   ;;  %s856_s18 = sphi %s894_s18, %s15_s18   ;;  %s852_s17 = sphi %s892_s17, %s1107_s17   ;;  %s848_s16 = sphi %s890_s16, %s1106_s16   ;;  %s844_s15 = sphi %s888_s15, %s1105_s15   ;;  %s840_s14 = sphi %s886_s14, %s1104_s14   ;;  %s836_s13 = sphi %s884_s13, %s1103_s13   ;;  %s832_s12 = sphi %s882_s12, %s1102_s12   ;;  %s828_s11 = sphi %s880_s11, %s1101_s11   ;;  %s824_s10 = sphi %s878_s10, %s1100_s10   ;;  %s820_s9 = sphi %s876_s9, %s1099_s9  }
   0x7   : > { %s24_s21 = sadd.s32 1, %s848_s16  ;;  %s27_s22 = sadd.s32 1, %s852_s17 }
   0x8   : > { %p25_p0 = scmp.ge.s32.totalorder %s24_s21, 2  ;;  %s60_s23 = sadd.s32 1, %s836_s13 }
   0x9   : > { %p67_p1 = scmp.ne.s32.totalorder %s836_s13, %s832_s12  ;;  %p68_p2 = scmp.eq.s32.totalorder %s856_s18, 0 }
   0xa   : > { %s1109_s21 = smov (%p25_p0, %s24_s21), 0  ;;  %s1111_s22 = smov (!%p25_p0, %s27_s22), %s852_s17 }
   0xb   : > { %p937_p3 = por %p68_p2, %p67_p1  ;;  %s83_s25 = ssub.s32 %s848_s16, %s1109_s21 }
   0xc   : > { %p29_p4 = scmp.ge.s32.totalorder %s1111_s22, 2  ;;  %s88_s26 = sadd.s32 1, %s828_s11 }
   0xd   : > { %p98_p5 = scmp.ne.s32.totalorder %s828_s11, %s824_s10  ;;  %p99_p6 = scmp.eq.s32.totalorder %s551_s19, 3 }
   0xe   : > { %s1113_s22 = smov (%p29_p4, %s1111_s22), 0  ;;  %p104_p8 = scmp.ne.s32.totalorder %s824_s10, %s820_s9 }
   0xf   : > { %p948_p7 = por %p99_p6, %p98_p5  ;;  %s57_s28 = ssub.s32 %s852_s17, %s1113_s22 }
  0x10   : > { %p105_p9 = scmp.eq.s32.totalorder %s552_s20, 3  ;;  %p58_p10 = scmp.eq.s32.totalorder %s57_s28, 0 }
  0x11   : > { %s85_s29 = sor.u32 %s83_s25, %s57_s28  ;;  %p554_p13 = scmp.ge.s32.totalorder %s856_s18, 4 }
  0x12   : > { %p86_p11 = scmp.eq.s32.totalorder %s85_s29, 0  ;;  %p956_p12 = por %p105_p9, %p104_p8 }
  0x13   : > { %s961_s3 = scalar_select %p58_p10, %s836_s13, %s60_s23  }
  0x14   : > { %s964_s4 = scalar_select %p86_p11, %s828_s11, %s88_s26  }
  0x15   : > { %121 = sbr.rel (%p554_p13) target bundleno = 46 (0x2e), region = 16 }
  0x1a   : > { %133 = sbr.rel (!%p937_p3) target bundleno = 46 (0x2e), region = 24  ;;  %s135_s5 = sand.u32 (%p937_p3), 1, %s836_s13  }
  0x1b   : > { %s634_s6 = sshll.u32 (%p937_p3), %s852_s17, 3  ;;  %s555_s7 = sshll.u32 (%p937_p3), %s135_s5, 7 }
  0x1c   : > { %s974_s20 = scalar_lea.vmem (%p937_p3), %s1094_s1, %s634_s6  ;;  %s137_s23 = scalar_lea.vmem (%p937_p3), [#allocation2], %s555_s7 }
  0x1d   : > { %v199_v0 = vld [vmem:[%s974_s20] sm:$0xff] (%p937_p3)  ;;  %v201_v1 = vld [vmem:[%s974_s20 + $0x10] sm:$0xff] (%p937_p3) }
  0x1e   : > { %v203_v2 = vld [vmem:[%s974_s20 + $0x20] sm:$0xff] (%p937_p3)  ;;  %200 = vst [vmem:[%s137_s23] sm:$0xff] (%p937_p3), %v199_v0  ;;  %v205_v3 = vld [vmem:[%s974_s20 + $0x30] sm:$0xff] (%p937_p3) }
  0x1f   : > { %202 = vst [vmem:[%s137_s23 + $0x8] sm:$0xff] %v201_v1  ;;  %v207_v4 = vld [vmem:[%s974_s20 + $0x40] sm:$0xff]  ;;  %v209_v5 = vld [vmem:[%s974_s20 + $0x50] sm:$0xff] }
  0x20   : > { %204 = vst [vmem:[%s137_s23 + $0x10] sm:$0xff] %v203_v2  ;;  %v211_v6 = vld [vmem:[%s974_s20 + $0x60] sm:$0xff]  ;;  %v213_v7 = vld [vmem:[%s974_s20 + $0x70] sm:$0xff] }
  0x21   : > { %206 = vst [vmem:[%s137_s23 + $0x18] sm:$0xff] %v205_v3  ;;  %v215_v8 = vld [vmem:[%s974_s20 + $0x80] sm:$0xff]  ;;  %v217_v9 = vld [vmem:[%s974_s20 + $0x90] sm:$0xff] }
  0x22   : > { %208 = vst [vmem:[%s137_s23 + $0x20] sm:$0xff] %v207_v4  ;;  %v219_v10 = vld [vmem:[%s974_s20 + $0xa0] sm:$0xff]  ;;  %v221_v11 = vld [vmem:[%s974_s20 + $0xb0] sm:$0xff] }
  0x23   : > { %210 = vst [vmem:[%s137_s23 + $0x28] sm:$0xff] %v209_v5  ;;  %v223_v12 = vld [vmem:[%s974_s20 + $0xc0] sm:$0xff]  ;;  %v225_v13 = vld [vmem:[%s974_s20 + $0xd0] sm:$0xff] }
  0x24   : > { %212 = vst [vmem:[%s137_s23 + $0x30] sm:$0xff] %v211_v6  ;;  %v227_v14 = vld [vmem:[%s974_s20 + $0xe0] sm:$0xff]  ;;  %v229_v15 = vld [vmem:[%s974_s20 + $0xf0] sm:$0xff] }
  0x25   : > { %214 = vst [vmem:[%s137_s23 + $0x38] sm:$0xff] %v213_v7 }
  0x26   : > { %216 = vst [vmem:[%s137_s23 + $0x40] sm:$0xff] %v215_v8 }
  0x27   : > { %218 = vst [vmem:[%s137_s23 + $0x48] sm:$0xff] %v217_v9 }
  0x28   : > { %220 = vst [vmem:[%s137_s23 + $0x50] sm:$0xff] %v219_v10 }
  0x29   : > { %222 = vst [vmem:[%s137_s23 + $0x58] sm:$0xff] %v221_v11 }
  0x2a   : > { %224 = vst [vmem:[%s137_s23 + $0x60] sm:$0xff] %v223_v12 }
  0x2b   : > { %226 = vst [vmem:[%s137_s23 + $0x68] sm:$0xff] %v225_v13 }
  0x2c   : > { %228 = vst [vmem:[%s137_s23 + $0x70] sm:$0xff] %v227_v14 }
  0x2d   : > { %230 = vst [vmem:[%s137_s23 + $0x78] sm:$0xff] %v229_v15 }
  0x2e PF: > { %p558_p0 = scmp.ge.s32.totalorder %s856_s18, 1  ;;  %p235_p1 = scmp.lt.s32.totalorder %s856_s18, 5 }
  0x30   : > { %p236_p2 = pnand %p558_p0, %p235_p1 }
  0x31   : > { %s561_s24 = sshll.u32 (!%p236_p2), %s840_s14, 1  ;;  %s242_s5 = sand.u32 (!%p236_p2), 1, %s832_s12  }
  0x32   : > { %239 = sbr.rel (%p236_p2) target bundleno = 349 (0x15d), region = 62  ;;  %p269_p3 = scmp.lt.s32.totalorder (!%p236_p2), %s561_s24, 3 }
  0x33   : > { %s559_s6 = sshll.u32 (!%p236_p2), %s242_s5, 7  ;;  %s265_s12 = sand.u32 (!%p236_p2), 1, %s824_s10  }
  0x34   : > { %s1007_s7 = scalar_lea.vmem (!%p236_p2), [#allocation2], %s559_s6  ;;  %s629_s8 = sshll.u32 (!%p236_p2), %s844_s15, 1 }
  0x35   : > { %s651_s19 = sshll.u32 (!%p236_p2), %s840_s14, 3  ;;  %s560_s20 = sshll.u32 (!%p236_p2), %s265_s12, 5 }
  0x36   : > { %s451_s23 = sadd.s32 (!%p236_p2), %s651_s19, %s629_s8  ;;  %s439_s14 = scalar_lea.sflag (!%p236_p2), [#allocation4], %s265_s12 }
  0x37   : > { %s1115_s24 = smov (!%p269_p3, %s561_s24), 3  ;;  %v621_v20 = vld [vmem:[%s1007_s7 + $0x70] sm:$0xf]  ;;  %v650_v21 = vld [vmem:[%s1007_s7 + $0x74] sm:$0xf0] }
  0x38   : > { %s562_s25 = sshll.u32 %s1115_s24, 3  ;;  %v649_v22 = vld [vmem:[%s1007_s7 + $0x74] sm:$0xf]  ;;  %v622_v23 = vor.u32 %v650_v21, %v621_v20  ;;  %v623_v24 = vld [vmem:[%s1007_s7 + $0x78] sm:$0xf0]  ;;  %s631_s24 = sshll.u32 %s451_s23, 3 }
  0x39   : > { %s272_s29 = scalar_lea.vmem %s1093_s0, %s562_s25  ;;  %v626_v25 = vor.u32 %v649_v22, %v623_v24  ;;  %v613_v26 = vld [vmem:[%s1007_s7 + $0x60] sm:$0xf]  ;;  %v648_v27 = vld [vmem:[%s1007_s7 + $0x64] sm:$0xf0]  ;;  %v647_v28 = vld [vmem:[%s1007_s7 + $0x64] sm:$0xf] }
  0x3a   : > { %v998_v16 = vld [vmem:[%s272_s29] sm:$0xff]  ;;  %v1002_v18 = vld [vmem:[%s272_s29 + $0x8] sm:$0xff]  ;;  %406 = vmatpush.bf16.msra.mxu0 %v622_v23  ;;  %v614_v29 = vor.u32 %v648_v27, %v613_v26  ;;  %v605_v32 = vld [vmem:[%s1007_s7 + $0x50] sm:$0xf]  ;;  %s267_s25 = scalar_lea.vmem [#allocation3], %s560_s20  ;;  %s453_s29 = scalar_lea.hbm %s1095_s2, %s631_s24 }
  0x3b   : > { %v279_v17 = vmul.f32 %v998_v16, %v998_v16  ;;  %v280_v19 = vmul.f32 %v1002_v18, %v1002_v18  ;;  %420 = vmatpush.bf16.msra.mxu1 %v626_v25  ;;  %v615_v30 = vld [vmem:[%s1007_s7 + $0x68] sm:$0xf0]  ;;  %v646_v33 = vld [vmem:[%s1007_s7 + $0x54] sm:$0xf0]  ;;  %v645_v34 = vld [vmem:[%s1007_s7 + $0x54] sm:$0xf] }
  0x3c   : > { %v618_v31 = vor.u32 %v647_v28, %v615_v30  ;;  %v606_v35 = vor.u32 %v646_v33, %v605_v32  ;;  %v607_v36 = vld [vmem:[%s1007_s7 + $0x58] sm:$0xf0]  ;;  %v597_v38 = vld [vmem:[%s1007_s7 + $0x40] sm:$0xf]  ;;  %v644_v39 = vld [vmem:[%s1007_s7 + $0x44] sm:$0xf0] }
  0x3d   : > { %281 = vadd.xlane.f32.xlu0 %v279_v17  ;;  %v610_v37 = vor.u32 %v645_v34, %v607_v36  ;;  %v643_v40 = vld [vmem:[%s1007_s7 + $0x44] sm:$0xf]  ;;  %v598_v41 = vor.u32 %v644_v39, %v597_v38  ;;  %v599_v42 = vld [vmem:[%s1007_s7 + $0x48] sm:$0xf0]  ;;  %v589_v44 = vld [vmem:[%s1007_s7 + $0x30] sm:$0xf] }
  0x3e   : > { %407 = vmatpush.bf16.msra.mxu0 %v614_v29  ;;  %v602_v43 = vor.u32 %v643_v40, %v599_v42  ;;  %v642_v45 = vld [vmem:[%s1007_s7 + $0x34] sm:$0xf0]  ;;  %v641_v46 = vld [vmem:[%s1007_s7 + $0x34] sm:$0xf]  ;;  %v591_v48 = vld [vmem:[%s1007_s7 + $0x38] sm:$0xf0] }
  0x3f   : > { %421 = vmatpush.bf16.msra.mxu1 %v618_v31  ;;  %v590_v47 = vor.u32 %v642_v45, %v589_v44  ;;  %v594_v49 = vor.u32 %v641_v46, %v591_v48  ;;  %v581_v50 = vld [vmem:[%s1007_s7 + $0x20] sm:$0xf]  ;;  %v640_v51 = vld [vmem:[%s1007_s7 + $0x24] sm:$0xf0]  ;;  %v639_v52 = vld [vmem:[%s1007_s7 + $0x24] sm:$0xf] }
  0x40   : > { %v582_v53 = vor.u32 %v640_v51, %v581_v50  ;;  %v583_v54 = vld [vmem:[%s1007_s7 + $0x28] sm:$0xf0]  ;;  %v573_v56 = vld [vmem:[%s1007_s7 + $0x10] sm:$0xf]  ;;  %v638_v57 = vld [vmem:[%s1007_s7 + $0x14] sm:$0xf0] }
  0x41   : > { %v586_v55 = vor.u32 %v639_v52, %v583_v54  ;;  %v637_v58 = vld [vmem:[%s1007_s7 + $0x14] sm:$0xf]  ;;  %v574_v59 = vor.u32 %v638_v57, %v573_v56  ;;  %v575_v60 = vld [vmem:[%s1007_s7 + $0x18] sm:$0xf0]  ;;  %v565_v61 = vld [vmem:[%s1007_s7] sm:$0xf] }
  0x42   : > { %408 = vmatpush.bf16.msra.mxu0 %v606_v35  ;;  %v636_v62 = vld [vmem:[%s1007_s7 + $0x4] sm:$0xf0]  ;;  %v578_v63 = vor.u32 %v637_v58, %v575_v60  ;;  %v635_v0 = vld [vmem:[%s1007_s7 + $0x4] sm:$0xf]  ;;  %v567_v1 = vld [vmem:[%s1007_s7 + $0x8] sm:$0xf0] }
  0x43   : > { %422 = vmatpush.bf16.msra.mxu1 %v610_v37  ;;  %v566_v2 = vor.u32 %v636_v62, %v565_v61  ;;  %v570_v3 = vor.u32 %v635_v0, %v567_v1  ;;  %s454_s5 = sshll.u32 %s267_s25, 4  ;;  %s456_s6 = sshll.u32 %s453_s29, 4  ;;  %s455_s5 = int_to_ptr.vmem [resolvable:$true] %s454_s5  ;;  %s457_s6 = int_to_ptr.hbm [resolvable:$true] %s456_s6 }
  0x44   : > { %s760_s15 = sshra.s32 %s457_s6, 4  ;;  %s766_s20 = scalar_lea.hbm %s1095_s2, 128  ;;  %s761_s15 = int_to_ptr.hbm [resolvable:$true] %s760_s15 }
  0x45   : > { %283 = vadd.xlane.f32.xlu0 %v280_v19  ;;  %s762_s7 = scalar_lea.hbm %s761_s15, 32  ;;  %p767_p8 = scmp.lt.s32.totalorder %s761_s15, %s1095_s2 }
  0x46   : > { %409 = vmatpush.bf16.msra.mxu0 %v598_v41  ;;  %p763_p4 = scmp.ne.s32.totalorder %s761_s15, %s762_s7  ;;  %p768_p9 = scmp.lt.s32.totalorder %s766_s20, %s762_s7 }
  0x47   : > { %423 = vmatpush.bf16.msra.mxu1 %v602_v43 }
  0x48   : > { %p764_p5 = pnand %p763_p4, %p948_p7  ;;  %p769_p10 = por %p768_p9, %p767_p8 }
  0x4a   : > { %410 = vmatpush.bf16.msra.mxu0 %v590_v47  ;;  %p765_p6 = pneg %p764_p5 }
  0x4b   : > { %424 = vmatpush.bf16.msra.mxu1 %v594_v49 }
  0x4c   : > { %p770_p11 = pnand %p769_p10, %p765_p6 }
  0x4e   : > { %411 = vmatpush.bf16.msra.mxu0 %v582_v53 }
  0x4f   : > { %425 = vmatpush.bf16.msra.mxu1 %v586_v55 }
  0x52   : > { %412 = vmatpush.bf16.msra.mxu0 %v574_v59 }
  0x53   : > { %426 = vmatpush.bf16.msra.mxu1 %v578_v63 }
  0x56   : > { %413 = vmatpush.bf16.msra.mxu0 %v566_v2 }
  0x57   : > { %427 = vmatpush.bf16.msra.mxu1 %v570_v3 }
  0xb0   : > { %v282_v4 = vpop.xlane.xlu0 %281 }
  0xb1   : > { %v285_v5 = vmax.f32 %v282_v4, 1e-24 }
  0xb3   : > { %742 = vrsqrt.f32 %v285_v5  ;;  %vm293_vm1 = vweird.f32 %v285_v5 }
  0xb8   : > { %v284_v6 = vpop.xlane.xlu0 %283 }
  0xb9   : > { %v743_v7 = vpop.eup %742  ;;  %v286_v8 = vmax.f32 %v284_v6, 1e-24 }
  0xba   : > { %v288_v9 = vmul.f32 %v743_v7, %v285_v5  ;;  %vm294_vm0 = vweird.f32 %v743_v7 }
  0xbb   : > { %744 = vrsqrt.f32 %v286_v8  ;;  %vm295_vm3 = vmor %vm293_vm1, %vm294_vm0  ;;  %vm303_vm4 = vweird.f32 %v286_v8 }
  0xbc   : > { %v289_v10 = vmul.f32 %v743_v7, %v288_v9 }
  0xbe   : > { %v290_v11 = vmul.f32 0.5, %v289_v10 }
  0xc0   : > { %v291_v13 = vsub.f32 1.5, %v290_v11 }
  0xc1   : > { %v745_v12 = vpop.eup %744 }
  0xc2   : > { %v298_v14 = vmul.f32 %v745_v12, %v286_v8  ;;  %v292_v19 = vmul.f32 %v743_v7, %v291_v13  ;;  %vm304_vm2 = vweird.f32 %v745_v12 }
  0xc3   : > { %vm305_vm5 = vmor %vm303_vm4, %vm304_vm2 }
  0xc4   : > { %v299_v15 = vmul.f32 %v745_v12, %v298_v14  ;;  %v296_v21 = vsel %vm295_vm3, %v743_v7, %v292_v19 }
  0xc5   : > { %v307_v24 = vmul.f32 %v296_v21, %v998_v16 }
  0xc6   : > { %v300_v17 = vmul.f32 0.5, %v299_v15 }
  0xc8   : > { %v301_v20 = vsub.f32 1.5, %v300_v17 }
  0xca   : > { %v302_v22 = vmul.f32 %v745_v12, %v301_v20 }
  0xcc   : > { %v306_v23 = vsel %vm305_vm5, %v745_v12, %v302_v22 }
  0xcd   : > { %v308_v25 = vmul.f32 %v306_v23, %v1002_v18 }
  0xcf   : > { %v309_v26 = vpack.c.bf16 %v308_v25, %v307_v24 }
  0xd1   : > { %414 = vmatmul.bf16.vlgmr.msra.gmra.mxu0 %v309_v26  ;;  %428 = vmatmul.bf16.vlgmr.msra.gmra.mxu1 %v309_v26 }
 0x14e   : > { %v415_v27 = vpop.f32.mrf.mxu0  ;;  %v429_v28 = vpop.f32.mrf.mxu1 }
 0x14f   : > { %434 = vst [vmem:[%s267_s25] sm:$0xff] %v415_v27 }
 0x150   : > { %435 = vst [vmem:[%s267_s25 + $0x8] sm:$0xff] %v429_v28 }
 0x156   : > { %v417_v16 = vpop.f32.mrf.mxu0  ;;  %v431_v18 = vpop.f32.mrf.mxu1 }
 0x157   : > { %436 = vst [vmem:[%s267_s25 + $0x10] sm:$0xff] %v417_v16 }
 0x158   : > { %437 = vst [vmem:[%s267_s25 + $0x18] sm:$0xff] %v431_v18 }
 0x159   : > { %773 = shalt.err (!%p770_p11)
}
 0x15a   : > { %s858_s12 = smov 256   ;;  %s859_s25 = smov 512  }
 0x15b   : > { %s860_s26 = smov 16  }
 0x15c   : > { %652 = dma.vmem_to_hbm [thread:$0]  (%p948_p7), %s455_s5, 512, %s457_s6, %s439_s14, %s858_s12, %s859_s25, %s860_s26  }
 0x15d PF: > { %p658_p13 = scmp.ge.s32.totalorder %s856_s18, 2  ;;  %s471_s28 = sand.u32 1, %s820_s9  }
 0x15e   : > { %s472_s29 = scalar_lea.sflag [#allocation4], %s471_s28 }
 0x15f   : > { %p655_p0 = pnand %p658_p13, %p956_p12 }
 0x161   : > { %p656_p1 = pneg %p655_p0 }
 0x163   : > { %815 = dma.done.wait (%p656_p1), %s472_s29, 512  }
 0x164   : > { %817 = vsyncadd (%p656_p1), %s472_s29, 4294966784  ;;  %s15_s18 = sadd.s32 1, %s856_s18   ;;  %s1099_s9 = smov %s824_s10 }
 0x165   : > { %p12_p2 = scmp.ge.s32.totalorder %s15_s18, 6   ;;  %s1100_s10 = smov %s828_s11 }
 0x166   : > { %s1101_s11 = smov %s964_s4  ;;  %s1102_s12 = smov %s836_s13 }
 0x167   : > { %s1103_s13 = smov %s961_s3  ;;  %s1104_s14 = smov %s848_s16 }
 0x168   : > { %s1105_s15 = smov %s852_s17  ;;  %s1106_s16 = smov %s1109_s21 }
 0x169   : > { %s1107_s17 = smov %s1113_s22  ;;  %14 = sbr.rel (!%p12_p2) target bundleno = 6 (0x6), region = 109 }
 0x16e   :  { %478 = vsyncpa [#allocation4], 1 }
 0x16f   :  { %480 = vsyncpa [#allocation4 + $0x1], 1 }

</bundles_post_ra>
